<compile_context>
chip_gen: v5e
topology: v5e:2x2
jax: 0.10.0
libtpu: 0.0.40
codegen_flags: <defaults>
</compile_context>

<pallas_src>
import functools

import numpy as np

import jax
import jax.numpy as jnp
from jax.experimental import pallas as pl
from jax.experimental.pallas import tpu as pltpu


# ---------------------------------------------------------------------------
# Pallas kernel: channel mean/max -> 7x7 conv (one MXU matmul) -> sigmoid
# ---------------------------------------------------------------------------
def _spatial_attention_kernel(x_ref, wk_ref, o_ref, pad_ref, *, H, W, KH):
    # x_ref  : (1, H, W, C)        input image, NHWC
    # wk_ref : (KH*2W, W)          banded conv weights (VMEM)
    # o_ref  : (1, H, W)           sigmoid attention map
    # pad_ref: (H + KH - 1, 2W)    row-padded planar [avg | max] map (VMEM scratch)
    halo = (KH - 1) // 2                                    # = 3 for a 7x7 kernel

    x = x_ref[0].astype(jnp.float32)                        # (H, W, C)
    avg = jnp.mean(x, axis=-1)                              # (H, W)  lane-axis reduce
    mx = jnp.max(x, axis=-1)                                # (H, W)

    # Planar [avg | max] map: one interior store; zero only the halo rows.
    zeros_halo = jnp.zeros((halo, 2 * W), jnp.float32)
    pad_ref[0:halo, :] = zeros_halo
    pad_ref[halo + H:halo + H + halo, :] = zeros_halo
    pad_ref[halo:halo + H, :] = jnp.concatenate([avg, mx], axis=-1)   # (H, 2W)

    # im2col over the KH row shifts only (kx taps + width zero-padding are
    # folded into the banded weight matrix) -> single (H, KH*2W) x (KH*2W, W)
    # MXU matmul instead of a 49x2 scalar-broadcast VPU loop.
    patches = jnp.concatenate(
        [pad_ref[ky:ky + H, :] for ky in range(KH)], axis=-1)         # (H, KH*2W)
    conv = jnp.dot(patches, wk_ref[...], preferred_element_type=jnp.float32)

    o_ref[0] = jax.nn.sigmoid(conv).astype(o_ref.dtype)


def _build_banded_weights(w_hwio, W):
    """Fold the kx taps (and width zero-padding) of a KHxKW, 2->1 conv into a
    banded matrix so the conv becomes one matmul:

        wk[ky*2W + c*W + jw, wo] = w[ky, kx, c]   with  kx = jw - wo + pad,

    valid when 0 <= kx < KW; columns outside [0, W) never appear, which
    implements the zero width-padding.  Built once in numpy (host-side)."""
    w = np.asarray(w_hwio)[..., 0]                          # (KH, KW, 2)
    KH, KW, _ = w.shape
    pad = (KW - 1) // 2
    wk = np.zeros((KH, 2 * W, W), np.float32)
    for ky in range(KH):
        for c in range(2):
            for wo in range(W):
                for kx in range(KW):
                    jw = wo + kx - pad
                    if 0 <= jw < W:
                        wk[ky, c * W + jw, wo] = w[ky, kx, c]
    return jnp.asarray(wk.reshape(KH * 2 * W, W))


def spatial_attention(x_nchw, w_hwio):
    """x_nchw: (N, C, H, W) — same layout the PyTorch module receives.
    w_hwio : (7, 7, 2, 1) conv weight (PyTorch (1,2,7,7) OIHW -> HWIO).
    Returns (N, 1, H, W) sigmoid spatial-attention map (PyTorch layout)."""
    N, C, H, W = x_nchw.shape
    KH = w_hwio.shape[0]
    x = jnp.transpose(x_nchw, (0, 2, 3, 1))                 # NHWC: C on the lane axis
    wk = _build_banded_weights(w_hwio, W)                   # (KH*2W, W)

    kern = functools.partial(_spatial_attention_kernel, H=H, W=W, KH=KH)
    out = pl.pallas_call(
        kern,
        out_shape=jax.ShapeDtypeStruct((N, H, W), x.dtype),
        grid=(N,),
        in_specs=[
            pl.BlockSpec((1, H, W, C), lambda b: (b, 0, 0, 0)),
            pl.BlockSpec((KH * 2 * W, W), lambda b: (0, 0)),   # conv weights in VMEM
        ],
        out_specs=pl.BlockSpec((1, H, W), lambda b: (b, 0, 0)),
        scratch_shapes=[pltpu.VMEM((H + KH - 1, 2 * W), jnp.float32)],
        compiler_params=pltpu.CompilerParams(dimension_semantics=("parallel",)),
    )(x, wk)
    return out[:, None, :, :]                               # (N, 1, H, W)


# ---------------------------------------------------------------------------
# Pure-JAX reference (for verification)
# ---------------------------------------------------------------------------
def ref_spatial_attention(x_nchw, w_hwio):
    x = jnp.transpose(x_nchw, (0, 2, 3, 1))                 # NHWC
    smap = jnp.concatenate(
        [jnp.mean(x, axis=-1, keepdims=True),
         jnp.max(x, axis=-1, keepdims=True)], axis=-1)      # (N, H, W, 2)
    pad = (w_hwio.shape[0] - 1) // 2
    y = jax.lax.conv_general_dilated(
        smap, w_hwio, (1, 1), [(pad, pad), (pad, pad)],
        dimension_numbers=("NHWC", "HWIO", "NHWC"))
    return jnp.transpose(jax.nn.sigmoid(y), (0, 3, 1, 2))   # (N, 1, H, W)


# ---------------------------------------------------------------------------
if __name__ == "__main__":
    key = jax.random.PRNGKey(0)
    k_x, k_w = jax.random.split(key)

    N, C, H, W = 2, 32, 16, 16
    x = jax.random.normal(k_x, (N, C, H, W), jnp.float32)               # NCHW input
    w_oihw = 0.2 * jax.random.normal(k_w, (1, 2, 7, 7), jnp.float32)    # Conv2d(2,1,7,pad=3)
    w_hwio = jnp.transpose(w_oihw, (2, 3, 1, 0))                        # -> HWIO (7,7,2,1)

    out = spatial_attention(x, w_hwio)
    out = jax.block_until_ready(out)

    ref = ref_spatial_attention(x, w_hwio)
    assert out.shape == ref.shape == (N, 1, H, W)
    err = float(jnp.max(jnp.abs(out - ref)))
    assert jnp.allclose(out, ref, rtol=1e-4, atol=1e-4), f"max abs err = {err}"

    print("KERNEL_OK")
</pallas_src>

<mosaic_0001>
module attributes {stable_mosaic.version = 11 : i64} {
  func.func @_spatial_attention_kernel(%arg0: i32, %arg1: memref<1x16x16x32xf32, #tpu.memory_space<vmem>>, %arg2: memref<224x16xf32, #tpu.memory_space<vmem>>, %arg3: memref<1x16x16xf32, #tpu.memory_space<vmem>>, %arg4: memref<22x32xf32, #tpu.memory_space<vmem>>) attributes {dimension_semantics = [#tpu.dimension_semantics<parallel>], iteration_bounds = array<i64: 2>, scalar_prefetch = 0 : i64, scratch_operands = 1 : i64, tpu.core_type = #tpu.core_type<tc>, window_params = [{transform_indices = @transform_0, window_bounds = array<i64: 1, 16, 16, 32>}, {pipeline_mode = #tpu.pipeline_mode<synchronous>, transform_indices = @transform_1, window_bounds = array<i64: 224, 16>}, {transform_indices = @transform_2, window_bounds = array<i64: 1, 16, 16>}]} {
    %c0 = arith.constant 0 : index
    %c0_0 = arith.constant 0 : index
    %c0_1 = arith.constant 0 : index
    %c0_2 = arith.constant 0 : index
    %0 = vector.load %arg1[%c0, %c0_0, %c0_1, %c0_2] : memref<1x16x16x32xf32, #tpu.memory_space<vmem>>, vector<1x16x16x32xf32>
    %1 = vector.shape_cast %0 : vector<1x16x16x32xf32> to vector<16x16x32xf32>
    %cst = arith.constant dense<0.000000e+00> : vector<16x16xf32>
    %2 = vector.multi_reduction <add>, %1, %cst [2] : vector<16x16x32xf32> to vector<16x16xf32>
    %cst_3 = arith.constant 3.200000e+01 : f32
    %3 = vector.broadcast %cst_3 : f32 to vector<16x16xf32>
    %4 = arith.divf %2, %3 : vector<16x16xf32>
    %cst_4 = arith.constant dense<0xFF800000> : vector<16x16xf32>
    %5 = vector.multi_reduction <maximumf>, %1, %cst_4 [2] : vector<16x16x32xf32> to vector<16x16xf32>
    %cst_5 = arith.constant 0.000000e+00 : f32
    %6 = vector.broadcast %cst_5 : f32 to vector<3x32xf32>
    %c0_6 = arith.constant 0 : index
    %c0_7 = arith.constant 0 : index
    %7 = vector.load %arg4[%c0_6, %c0_7] : memref<22x32xf32, #tpu.memory_space<vmem>>, vector<3x32xf32>
    tpu.vector_store %arg4[%c0_6, %c0_7], %6 {strides = array<i32>} : memref<22x32xf32, #tpu.memory_space<vmem>>, vector<3x32xf32>,
    %c19 = arith.constant 19 : index
    %c0_8 = arith.constant 0 : index
    %8 = vector.load %arg4[%c19, %c0_8] : memref<22x32xf32, #tpu.memory_space<vmem>>, vector<3x32xf32>
    tpu.vector_store %arg4[%c19, %c0_8], %6 {strides = array<i32>} : memref<22x32xf32, #tpu.memory_space<vmem>>, vector<3x32xf32>,
    %9 = tpu.concatenate %4, %5 in 1 : vector<16x16xf32>, vector<16x16xf32> -> vector<16x32xf32>
    %c3 = arith.constant 3 : index
    %c0_9 = arith.constant 0 : index
    %10 = vector.load %arg4[%c3, %c0_9] : memref<22x32xf32, #tpu.memory_space<vmem>>, vector<16x32xf32>
    tpu.vector_store %arg4[%c3, %c0_9], %9 {strides = array<i32>} : memref<22x32xf32, #tpu.memory_space<vmem>>, vector<16x32xf32>,
    %c0_10 = arith.constant 0 : index
    %c0_11 = arith.constant 0 : index
    %11 = vector.load %arg4[%c0_10, %c0_11] : memref<22x32xf32, #tpu.memory_space<vmem>>, vector<16x32xf32>
    %c1 = arith.constant 1 : index
    %c0_12 = arith.constant 0 : index
    %12 = vector.load %arg4[%c1, %c0_12] : memref<22x32xf32, #tpu.memory_space<vmem>>, vector<16x32xf32>
    %c2 = arith.constant 2 : index
    %c0_13 = arith.constant 0 : index
    %13 = vector.load %arg4[%c2, %c0_13] : memref<22x32xf32, #tpu.memory_space<vmem>>, vector<16x32xf32>
    %c3_14 = arith.constant 3 : index
    %c0_15 = arith.constant 0 : index
    %14 = vector.load %arg4[%c3_14, %c0_15] : memref<22x32xf32, #tpu.memory_space<vmem>>, vector<16x32xf32>
    %c4 = arith.constant 4 : index
    %c0_16 = arith.constant 0 : index
    %15 = vector.load %arg4[%c4, %c0_16] : memref<22x32xf32, #tpu.memory_space<vmem>>, vector<16x32xf32>
    %c5 = arith.constant 5 : index
    %c0_17 = arith.constant 0 : index
    %16 = vector.load %arg4[%c5, %c0_17] : memref<22x32xf32, #tpu.memory_space<vmem>>, vector<16x32xf32>
    %c6 = arith.constant 6 : index
    %c0_18 = arith.constant 0 : index
    %17 = vector.load %arg4[%c6, %c0_18] : memref<22x32xf32, #tpu.memory_space<vmem>>, vector<16x32xf32>
    %18 = tpu.concatenate %11, %12, %13, %14, %15, %16, %17 in 1 : vector<16x32xf32>, vector<16x32xf32>, vector<16x32xf32>, vector<16x32xf32>, vector<16x32xf32>, vector<16x32xf32>, vector<16x32xf32> -> vector<16x224xf32>
    %c0_19 = arith.constant 0 : index
    %c0_20 = arith.constant 0 : index
    %19 = vector.load %arg2[%c0_19, %c0_20] : memref<224x16xf32, #tpu.memory_space<vmem>>, vector<224x16xf32>
    %cst_21 = arith.constant dense<0.000000e+00> : vector<16x16xf32>
    %20 = tpu.matmul %18, %19, %cst_21 {dimension_numbers = #tpu.dot_dimension_numbers<[1], [0], [0], [1], [0, 0, 1, 1], [], []>} : vector<16x224xf32>, vector<224x16xf32>, vector<16x16xf32> -> vector<16x16xf32>
    %21 = arith.negf %20 : vector<16x16xf32>
    %22 = math.exp %21 : vector<16x16xf32>
    %cst_22 = arith.constant 1.000000e+00 : f32
    %23 = vector.broadcast %cst_22 : f32 to vector<16x16xf32>
    %24 = arith.addf %23, %22 : vector<16x16xf32>
    %25 = arith.divf %23, %24 : vector<16x16xf32>
    %c0_23 = arith.constant 0 : index
    %c0_24 = arith.constant 0 : index
    %c0_25 = arith.constant 0 : index
    %26 = vector.load %arg3[%c0_23, %c0_24, %c0_25] : memref<1x16x16xf32, #tpu.memory_space<vmem>>, vector<1x16x16xf32>
    %27 = vector.shape_cast %26 : vector<1x16x16xf32> to vector<16x16xf32>
    %28 = vector.shape_cast %25 : vector<16x16xf32> to vector<1x16x16xf32>
    tpu.vector_store %arg3[%c0_23, %c0_24, %c0_25], %28 {strides = array<i32>} : memref<1x16x16xf32, #tpu.memory_space<vmem>>, vector<1x16x16xf32>,
    return
  }
  func.func @transform_0(%arg0: i32) -> (i32, i32, i32, i32) {
    %c0_i32 = arith.constant 0 : i32
    %c0_i32_0 = arith.constant 0 : i32
    %c0_i32_1 = arith.constant 0 : i32
    %c0_i32_2 = arith.constant 0 : i32
    return %arg0, %c0_i32, %c0_i32_0, %c0_i32_1 : i32, i32, i32, i32
  }
  func.func @transform_1(%arg0: i32) -> (i32, i32) {
    %c0_i32 = arith.constant 0 : i32
    %c0_i32_0 = arith.constant 0 : i32
    %c0_i32_1 = arith.constant 0 : i32
    return %c0_i32, %c0_i32_0 : i32, i32
  }
  func.func @transform_2(%arg0: i32) -> (i32, i32, i32) {
    %c0_i32 = arith.constant 0 : i32
    %c0_i32_0 = arith.constant 0 : i32
    %c0_i32_1 = arith.constant 0 : i32
    return %arg0, %c0_i32, %c0_i32_0 : i32, i32, i32
  }
}

</mosaic_0001>

<bundles_post_ra>
// kernel: tpu_custom_call.1
= control target key start
LH: loop header
LB: loop body
LE: loop exit
PB: predicated region body
PF: predicated region fallthrough
CT: control target
= control target key end

     0   :  { %7 = vsyncpa [#allocation4], 0  ;;  %s1737_s0 = inlined_call_operand.hbm [shape: f32[2,16,16,32], index: 0, kind: input, shape index: {}]   ;;  %s1738_s1 = inlined_call_operand.vmem [shape: f32[224,16], index: 1, kind: input, shape index: {}]   ;;  %s1739_s2 = inlined_call_operand.hbm [shape: f32[2,16,16], index: 2, kind: output, shape index: {}]  }
   0x1   :  { %9 = vsyncpa [#allocation4 + $0x1], 0 }
   0x2   :  { %10 = vsyncpa [#allocation5], 0 }
   0x3   :  { %12 = vsyncpa [#allocation5 + $0x1], 0  ;;  %s1150_s9 = smov 0   ;;  %s1152_s10 = smov 0  }
   0x4   :  { %s1154_s11 = smov 0   ;;  %s1156_s12 = smov 0  }
   0x5 LB: > { %s1171_s13 = sadd.s32 4294967295, %s1124_s12   ;;  %s917_s14 = sadd.s32 4294967294, %s1124_s12   ;;  %s1124_s12 = sphi %s1156_s12, %s1749_s12   ;;  %s1120_s11 = sphi %s1154_s11, %s1748_s11   ;;  %s1116_s10 = sphi %s1152_s10, %s1747_s10   ;;  %s1112_s9 = sphi %s1150_s9, %s1746_s9  }
   0x6   : > { %s1175_s15 = sadd.s32 1, %s1124_s12   ;;  %s25_s16 = sadd.s32 1, %s1120_s11 }
   0x7   : > { %s22_s17 = ssub.s32 %s1124_s12, %s1175_s15  ;;  %p32_p0 = scmp.ne.s32.totalorder %s1120_s11, %s1116_s10 }
   0x8   : > { %p23_p1 = scmp.eq.s32.totalorder %s22_s17, 0  ;;  %p33_p2 = scmp.eq.s32.totalorder %s1124_s12, 0 }
   0x9   : > { %p38_p3 = scmp.ne.s32.totalorder %s1116_s10, %s1112_s9  ;;  %p39_p4 = scmp.eq.s32.totalorder %s1171_s13, 0 }
   0xa   : > { %s1187_s18 = scalar_select %p23_p1, %s1120_s11, %s25_s16  }
   0xb   : > { %p1189_p5 = por %p33_p2, %p32_p0  ;;  %p1193_p6 = por %p39_p4, %p38_p3 }
   0xc   : > { %p83_p7 = scmp.eq.s32.totalorder %s1171_s13, 1  ;;  %p89_p8 = scmp.eq.s32.totalorder %s917_s14, 1 }
   0xd   : > { %p965_p10 = scmp.lt.s32.totalorder %s1124_s12, 2  ;;  %s112_s23 = sand.u32 1, %s1120_s11  }
   0xe   : > { %p1200_p11 = por %p83_p7, %p32_p0  ;;  %p1204_p12 = por %p89_p8, %p38_p3 }
   0xf   : > { %s935_s24 = sshll.u32 %s1124_s12, 8  ;;  %s920_s25 = sshll.u32 %s112_s23, 8 }
  0x10   : > { %s121_s28 = scalar_lea.hbm %s1737_s0, %s935_s24  ;;  %s116_s30 = scalar_lea.vmem [#allocation3], %s920_s25 }
  0x11   : > { %s122_s29 = sshll.u32 %s121_s28, 4  ;;  %s124_s3 = sshll.u32 %s116_s30, 4  ;;  %s123_s29 = int_to_ptr.hbm [resolvable:$true] %s122_s29  ;;  %s125_s3 = int_to_ptr.vmem [resolvable:$true] %s124_s3 }
  0x12   : > { %p1215_p13 = pnand %p965_p10, %p1189_p5  ;;  %p923_p0 = scmp.ge.s32.totalorder %s1124_s12, 1 }
  0x13   : > { %p132_p1 = scmp.lt.s32.totalorder %s1124_s12, 3  ;;  %s113_s5 = scalar_lea.sflag [#allocation4], %s112_s23 }
  0x14   : > { %s1028_s6 = sshra.s32 %s123_s29, 4  ;;  %p1032_p3 = pneg %p1215_p13  ;;  %s1029_s6 = int_to_ptr.hbm [resolvable:$true] %s1028_s6 }
  0x15   : > { %s1030_s7 = scalar_lea.hbm %s1029_s6, 256  ;;  %s1035_s16 = scalar_lea.hbm %s1737_s0, 512 }
  0x16   : > { %p1031_p2 = scmp.ne.s32.totalorder %s1029_s6, %s1030_s7  ;;  %p1036_p5 = scmp.lt.s32.totalorder %s1029_s6, %s1737_s0 }
  0x17   : > { %p1037_p8 = scmp.lt.s32.totalorder %s1035_s16, %s1030_s7 }
  0x18   : > { %p1033_p4 = pnand %p1032_p3, %p1031_p2 }
  0x19   : > { %p1038_p10 = por %p1037_p8, %p1036_p5 }
  0x1a   : > { %p1034_p7 = pneg %p1033_p4 }
  0x1c   : > { %p1039_p9 = pnand %p1038_p10, %p1034_p7 }
  0x1e   : > { %1042 = shalt.err (!%p1039_p9)
}
  0x1f   : > { %s1126_s23 = smov 128   ;;  %s1127_s24 = smov 8  }
  0x20   : > { %960 = dma.hbm_to_vmem [thread:$0]  (!%p1215_p13), %s123_s29, 4096, %s125_s3, %s113_s5, %s1126_s23, %s1126_s23, %s1127_s24  }
  0x21   : > { %p133_p2 = pnand %p923_p0, %p132_p1 }
  0x22   : > { %s1236_s25 = sand.u32 (!%p133_p2), 1, %s1116_s10  }
  0x23   : > { %136 = sbr.rel (%p133_p2) target bundleno = 634 (0x27a), region = 28  ;;  %s924_s26 = sshll.u32 (!%p133_p2), %s1236_s25, 8 }
  0x24   : > { %s139_s27 = scalar_lea.sflag (!%p133_p2), [#allocation4], %s1236_s25  ;;  %s1240_s28 = scalar_lea.vmem (!%p133_p2), [#allocation3], %s924_s26 }
  0x28   : > { %1103 = dma.done.wait (%p1193_p6), %s139_s27, 4096  }
  0x29   : > { %1105 = vsyncadd (%p1193_p6), %s139_s27, 4294963200  ;;  %vm196_vm0 = vcmask 261120   ;;  %v180_v0 = vld [vmem:[%s1240_s28 + $0x80] sm:$0xff]  ;;  %v166_v1 = vld [vmem:[%s1240_s28 + $0x10] sm:$0xff]  ;;  %v1128_v63 = vmov 32.0   ;;  %vm468_vm2 = vcmask 130112  }
  0x2a   : > { %v164_v2 = vld [vmem:[%s1240_s28] sm:$0xff]  ;;  %v245_v3 = vsel %vm196_vm0, %v180_v0, 0.0  ;;  %v203_v4 = vsel %vm196_vm0, %v166_v1, 0.0  ;;  %v181_v6 = vld [vmem:[%s1240_s28 + $0x88] sm:$0xff]  ;;  %v167_v7 = vld [vmem:[%s1240_s28 + $0x18] sm:$0xff]  ;;  %v380_v34 = vsel %vm196_vm0, %v180_v0, -inf  ;;  %1018 = vrcp.f32 %v1128_v63 }
  0x2b   : > { %v197_v5 = vsel %vm196_vm0, %v164_v2, 0.0  ;;  %246 = vadd.xlane.f32.xlu2 %v245_v3  ;;  %204 = vadd.xlane.f32.xlu1 %v203_v4  ;;  %v165_v8 = vld [vmem:[%s1240_s28 + $0x8] sm:$0xff]  ;;  %v248_v9 = vsel %vm196_vm0, %v181_v6, 0.0  ;;  %v206_v10 = vsel %vm196_vm0, %v167_v7, 0.0  ;;  %v168_v12 = vld [vmem:[%s1240_s28 + $0x20] sm:$0xff]  ;;  %v183_v13 = vld [vmem:[%s1240_s28 + $0x98] sm:$0xff] }
  0x2c   : > { %198 = vadd.xlane.f32.xlu0 %v197_v5  ;;  %v200_v11 = vsel %vm196_vm0, %v165_v8, 0.0  ;;  %v182_v14 = vld [vmem:[%s1240_s28 + $0x90] sm:$0xff]  ;;  %v209_v15 = vsel %vm196_vm0, %v168_v12, 0.0  ;;  %v254_v16 = vsel %vm196_vm0, %v183_v13, 0.0  ;;  %v185_v18 = vld [vmem:[%s1240_s28 + $0xa8] sm:$0xff]  ;;  %v184_v19 = vld [vmem:[%s1240_s28 + $0xa0] sm:$0xff] }
  0x2d   : > { %v251_v17 = vsel %vm196_vm0, %v182_v14, 0.0  ;;  %v169_v20 = vld [vmem:[%s1240_s28 + $0x28] sm:$0xff]  ;;  %v260_v21 = vsel %vm196_vm0, %v185_v18, 0.0  ;;  %v257_v22 = vsel %vm196_vm0, %v184_v19, 0.0  ;;  %v186_v24 = vld [vmem:[%s1240_s28 + $0xb0] sm:$0xff]  ;;  %v171_v25 = vld [vmem:[%s1240_s28 + $0x38] sm:$0xff] }
  0x2e   : > { %v212_v23 = vsel %vm196_vm0, %v169_v20, 0.0  ;;  %v170_v26 = vld [vmem:[%s1240_s28 + $0x30] sm:$0xff]  ;;  %v263_v27 = vsel %vm196_vm0, %v186_v24, 0.0  ;;  %v218_v28 = vsel %vm196_vm0, %v171_v25, 0.0  ;;  %v1277_v30 = vld [vmem:[%s1240_s28 + $0xb8] sm:$0xff]  ;;  %v335_v31 = vsel %vm196_vm0, %v165_v8, -inf }
  0x2f   : > { %v215_v29 = vsel %vm196_vm0, %v170_v26, 0.0  ;;  %v332_v32 = vsel %vm196_vm0, %v164_v2, -inf  ;;  %v266_v33 = vsel %vm196_vm0, %v1277_v30, 0.0  ;;  %v341_v35 = vsel %vm196_vm0, %v167_v7, -inf  ;;  %v1290_v40 = vld [vmem:[%s1240_s28 + $0xc0] sm:$0xff]  ;;  %v1293_v41 = vld [vmem:[%s1240_s28 + $0x48] sm:$0xff] }
  0x30   : > { %v338_v36 = vsel %vm196_vm0, %v166_v1, -inf  ;;  %v389_v37 = vsel %vm196_vm0, %v183_v13, -inf  ;;  %v386_v38 = vsel %vm196_vm0, %v182_v14, -inf  ;;  %v383_v39 = vsel %vm196_vm0, %v181_v6, -inf  ;;  %v172_v42 = vld [vmem:[%s1240_s28 + $0x40] sm:$0xff]  ;;  %v189_v46 = vld [vmem:[%s1240_s28 + $0xc8] sm:$0xff]  ;;  %v1019_v2 = vpop.eup %1018 }
  0x31   : > { %v269_v43 = vsel %vm196_vm0, %v1290_v40, 0.0  ;;  %v224_v44 = vsel %vm196_vm0, %v1293_v41, 0.0  ;;  %v221_v45 = vsel %vm196_vm0, %v172_v42, 0.0  ;;  %v347_v47 = vsel %vm196_vm0, %v169_v20, -inf  ;;  %v1306_v50 = vld [vmem:[%s1240_s28 + $0x50] sm:$0xff]  ;;  %v1313_v54 = vld [vmem:[%s1240_s28 + $0xd8] sm:$0xff] }
  0x32   : > { %v344_v48 = vsel %vm196_vm0, %v168_v12, -inf  ;;  %v272_v49 = vsel %vm196_vm0, %v189_v46, 0.0  ;;  %v227_v51 = vsel %vm196_vm0, %v1306_v50, 0.0  ;;  %v395_v52 = vsel %vm196_vm0, %v185_v18, -inf  ;;  %v1316_v55 = vld [vmem:[%s1240_s28 + $0xd0] sm:$0xff]  ;;  %v1319_v56 = vld [vmem:[%s1240_s28 + $0x58] sm:$0xff] }
  0x33   : > { %249 = vadd.xlane.f32.xlu2 %v248_v9  ;;  %207 = vadd.xlane.f32.xlu1 %v206_v10  ;;  %v392_v53 = vsel %vm196_vm0, %v184_v19, -inf  ;;  %v278_v57 = vsel %vm196_vm0, %v1313_v54, 0.0  ;;  %v275_v58 = vsel %vm196_vm0, %v1316_v55, 0.0  ;;  %v230_v59 = vsel %vm196_vm0, %v1319_v56, 0.0  ;;  %v1331_v0 = vld [vmem:[%s1240_s28 + $0x68] sm:$0xff]  ;;  %v1334_v1 = vld [vmem:[%s1240_s28 + $0x60] sm:$0xff] }
  0x34   : > { %201 = vadd.xlane.f32.xlu0 %v200_v11  ;;  %v398_v60 = vsel %vm196_vm0, %v186_v24, -inf  ;;  %v353_v61 = vsel %vm196_vm0, %v171_v25, -inf  ;;  %v350_v62 = vsel %vm196_vm0, %v170_v26, -inf  ;;  %v236_v3 = vsel %vm196_vm0, %v1331_v0, 0.0  ;;  %v1343_v7 = vld [vmem:[%s1240_s28 + $0xe8] sm:$0xff]  ;;  %v1346_v8 = vld [vmem:[%s1240_s28 + $0xe0] sm:$0xff] }
  0x35   : > { %v233_v4 = vsel %vm196_vm0, %v1334_v1, 0.0  ;;  %v401_v5 = vsel %vm196_vm0, %v1277_v30, -inf  ;;  %v294_v6 = vmul.f32 32.0, %v1019_v2  ;;  %v356_v10 = vsel %vm196_vm0, %v172_v42, -inf  ;;  %s1130_s24 = smov 64   ;;  %s1131_s26 = smov 32  }
  0x36   : > { %v284_v11 = vsel %vm196_vm0, %v1343_v7, 0.0  ;;  %v281_v12 = vsel %vm196_vm0, %v1346_v8, 0.0  ;;  %vm298_vm1 = vweird.f32 %v1019_v2  ;;  %v407_v19 = vsel %vm196_vm0, %v189_v46, -inf  ;;  %s1132_s27 = smov 96   ;;  %s925_s5 = sshll.u32 %s1236_s25, 4 }
  0x37   : > { %v295_v9 = vsub.f32 1.0, %v294_v6  ;;  %v404_v20 = vsel %vm196_vm0, %v1290_v40, -inf  ;;  %vm515_vm3 = vcmask 1041409   ;;  %vm517_vm4 = vcmask 1042434   ;;  %s163_s6 = scalar_lea.vmem [#allocation6], %s925_s5  ;;  %s936_s7 = sshll.u32 %s1171_s13, 4 }
  0x38   : > { %vm519_vm5 = vcmask 1043459   ;;  %vm574_vm6 = vcmask 261312   ;;  %vm521_vm7 = vcmask 1044484   ;;  %vm523_vm8 = vcmask 1045509   ;;  %s840_s16 = scalar_lea.hbm %s1739_s2, %s936_s7  ;;  %s841_s17 = sshll.u32 %s163_s6, 4  ;;  %s842_s17 = int_to_ptr.vmem [resolvable:$true] %s841_s17 }
  0x39   : > { %v296_v13 = vmul.f32 %v1019_v2, %v295_v9  ;;  %vm428_vm9 = vcmask 256000   ;;  %vm525_vm10 = vcmask 1046534   ;;  %vm527_vm11 = vcmask 1047559   ;;  %s843_s19 = sshll.u32 %s840_s16, 4  ;;  %s829_s13 = scalar_lea.sflag [#allocation5], %s1236_s25  ;;  %s844_s19 = int_to_ptr.hbm [resolvable:$true] %s843_s19 }
  0x3a   : > { %vm637_vm12 = vcmask 130048   ;;  %vm698_vm13 = vcmask 523264   ;;  %vm701_vm14 = vcmask 785408   ;;  %s1072_s23 = sshra.s32 %s844_s19, 4  ;;  %s1073_s23 = int_to_ptr.hbm [resolvable:$true] %s1072_s23 }
  0x3b   : > { %210 = vadd.xlane.f32.xlu2 %v209_v15  ;;  %255 = vadd.xlane.f32.xlu1 %v254_v16  ;;  %v297_v14 = vadd.f32 %v1019_v2, %v296_v13  ;;  %v368_v13 = vsel %vm196_vm0, %v1334_v1, -inf  ;;  %p1079_p0 = scmp.lt.s32.totalorder %s1073_s23, %s1739_s2 }
  0x3c   : > { %252 = vadd.xlane.f32.xlu0 %v251_v17  ;;  %v463_v17 = vlaneseq }
  0x43   : > { %261 = vadd.xlane.f32.xlu2 %v260_v21  ;;  %258 = vadd.xlane.f32.xlu1 %v257_v22  ;;  %v359_v21 = vsel %vm196_vm0, %v1293_v41, -inf  ;;  %v1358_v22 = vsel %vm298_vm1, %v1019_v2, %v297_v14  ;;  %v413_v14 = vsel %vm196_vm0, %v1313_v54, -inf }
  0x44   : > { %213 = vadd.xlane.f32.xlu0 %v212_v23  ;;  %v1360_v23 = vand.u32 127, %v463_v17  ;;  %v410_v17 = vsel %vm196_vm0, %v1316_v55, -inf }
  0x46   : > { %v1365_v26 = vadd.s32 4294967288, %v1360_v23 }
  0x4b   : > { %264 = vadd.xlane.f32.xlu2 %v263_v27  ;;  %219 = vadd.xlane.f32.xlu1 %v218_v28  ;;  %v1368_v27 = vld [vmem:[%s1240_s28 + $0xf0] sm:$0xff]  ;;  %v1371_v28 = vld [vmem:[%s1240_s28 + $0x78] sm:$0xff] }
  0x4c   : > { %216 = vadd.xlane.f32.xlu0 %v215_v29  ;;  %v242_v40 = vsel %vm196_vm0, %v1371_v28, 0.0 }
  0x53   : > { %336 = vmax.xlane.f32.xlu2 %v335_v31  ;;  %333 = vmax.xlane.f32.xlu1 %v332_v32  ;;  %v1375_v32 = vld [vmem:[%s1240_s28 + $0x70] sm:$0xff] }
  0x54   : > { %267 = vadd.xlane.f32.xlu0 %v266_v33 }
  0x5b   : > { %381 = vmax.xlane.f32.xlu2 %v380_v34  ;;  %342 = vmax.xlane.f32.xlu1 %v341_v35 }
  0x5c   : > { %339 = vmax.xlane.f32.xlu0 %v338_v36 }
  0x63   : > { %390 = vmax.xlane.f32.xlu2 %v389_v37  ;;  %387 = vmax.xlane.f32.xlu1 %v386_v38 }
  0x64   : > { %384 = vmax.xlane.f32.xlu0 %v383_v39  ;;  %v287_v39 = vsel %vm196_vm0, %v1368_v27, 0.0 }
  0x6b   : > { %270 = vadd.xlane.f32.xlu2 %v269_v43  ;;  %225 = vadd.xlane.f32.xlu1 %v224_v44  ;;  %v239_v43 = vsel %vm196_vm0, %v1375_v32, 0.0 }
  0x6c   : > { %222 = vadd.xlane.f32.xlu0 %v221_v45 }
  0x73   : > { %348 = vmax.xlane.f32.xlu2 %v347_v47  ;;  %345 = vmax.xlane.f32.xlu1 %v344_v48 }
  0x74   : > { %273 = vadd.xlane.f32.xlu0 %v272_v49 }
  0x7b   : > { %228 = vadd.xlane.f32.xlu2 %v227_v51  ;;  %396 = vmax.xlane.f32.xlu1 %v395_v52 }
  0x7c   : > { %393 = vmax.xlane.f32.xlu0 %v392_v53  ;;  %v1397_v53 = vld [vmem:[%s1240_s28 + $0xf8] sm:$0xff]  ;;  %s1078_s28 = scalar_lea.hbm %s1739_s2, 32 }
  0x7d   : > { %v290_v63 = vsel %vm196_vm0, %v1397_v53, 0.0 }
  0x83   : > { %279 = vadd.xlane.f32.xlu2 %v278_v57  ;;  %276 = vadd.xlane.f32.xlu1 %v275_v58 }
  0x84   : > { %231 = vadd.xlane.f32.xlu0 %v230_v59 }
  0x8b   : > { %399 = vmax.xlane.f32.xlu2 %v398_v60  ;;  %354 = vmax.xlane.f32.xlu1 %v353_v61  ;;  %v365_v60 = vsel %vm196_vm0, %v1319_v56, -inf  ;;  %v362_v61 = vsel %vm196_vm0, %v1306_v50, -inf }
  0x8c   : > { %351 = vmax.xlane.f32.xlu0 %v350_v62 }
  0x93   : > { %237 = vadd.xlane.f32.xlu2 %v236_v3  ;;  %234 = vadd.xlane.f32.xlu1 %v233_v4 }
  0x94   : > { %402 = vmax.xlane.f32.xlu0 %v401_v5 }
  0x9b   : > { %357 = vmax.xlane.f32.xlu2 %v356_v10  ;;  %285 = vadd.xlane.f32.xlu1 %v284_v11 }
  0x9c   : > { %282 = vadd.xlane.f32.xlu0 %v281_v12 }
  0x9e   : > { %v247_v15 = vpop.xlane.xlu2 %246  ;;  %v205_v16 = vpop.xlane.xlu1 %204 }
  0x9f   : > { %v199_v18 = vpop.xlane.xlu0 %198  ;;  %v316_v24 = vmul.f32 %v1358_v22, %v247_v15  ;;  %v302_v25 = vmul.f32 %v1358_v22, %v205_v16 }
  0xa0   : > { %v300_v29 = vmul.f32 %v1358_v22, %v199_v18 }
  0xa1   : > { %v491_v33 = vperm.slane %v316_v24, %v1360_v23  ;;  %v470_v34 = vperm.slane %v302_v25, %v1360_v23 }
  0xa2   : > { %v465_v44 = vperm.slane %v300_v29, %v1360_v23 }
  0xa3   : > { %408 = vmax.xlane.f32.xlu2 %v407_v19  ;;  %405 = vmax.xlane.f32.xlu1 %v404_v20 }
  0xa4   : > { %360 = vmax.xlane.f32.xlu0 %v359_v21 }
  0xa6   : > { %v250_v30 = vpop.xlane.xlu2 %249  ;;  %v208_v31 = vpop.xlane.xlu1 %207 }
  0xa7   : > { %v317_v35 = vmul.f32 %v1358_v22, %v250_v30  ;;  %v303_v36 = vmul.f32 %v1358_v22, %v208_v31  ;;  %v202_v37 = vpop.xlane.xlu0 %201  ;;  %v419_v30 = vsel %vm196_vm0, %v1343_v7, -inf  ;;  %v416_v31 = vsel %vm196_vm0, %v1346_v8, -inf }
  0xa8   : > { %v301_v38 = vmul.f32 %v1358_v22, %v202_v37  ;;  %v1443_v37 = vadd.s32 4294967280, %v1360_v23 }
  0xa9   : > { %v492_v41 = vperm.slane %v317_v35, %v1365_v26  ;;  %v471_v42 = vperm.slane %v303_v36, %v1365_v26  ;;  %v1440_v36 = vadd.s32 4294967272, %v1360_v23 }
  0xaa   : > { %v467_v45 = vperm.slane %v301_v38, %v1365_v26 }
  0xab   : > { %v493_v46 = vsel %vm468_vm2, %v492_v41, %v491_v33  ;;  %v472_v47 = vsel %vm468_vm2, %v471_v42, %v470_v34  ;;  %288 = vadd.xlane.f32.xlu2 %v287_v39  ;;  %243 = vadd.xlane.f32.xlu1 %v242_v40  ;;  %v371_v34 = vsel %vm196_vm0, %v1331_v0, -inf }
  0xac   : > { %v469_v48 = vsel %vm468_vm2, %v467_v45, %v465_v44  ;;  %240 = vadd.xlane.f32.xlu0 %v239_v43  ;;  %v377_v45 = vsel %vm196_vm0, %v1371_v28, -inf }
  0xad   : > { %v516_v49 = vsel %vm515_vm3, %v472_v47, %v469_v48  ;;  %v374_v48 = vsel %vm196_vm0, %v1375_v32, -inf }
  0xae   : > { %v211_v51 = vpop.xlane.xlu2 %210  ;;  %v256_v52 = vpop.xlane.xlu1 %255 }
  0xaf   : > { %v319_v57 = vmul.f32 %v1358_v22, %v256_v52  ;;  %v253_v58 = vpop.xlane.xlu0 %252  ;;  %v304_v3 = vmul.f32 %v1358_v22, %v211_v51 }
  0xb0   : > { %v318_v59 = vmul.f32 %v1358_v22, %v253_v58 }
  0xb1   : > { %v495_v62 = vperm.slane %v319_v57, %v1365_v26  ;;  %v473_v11 = vperm.slane %v304_v3, %v1360_v23 }
  0xb2   : > { %v494_v2 = vperm.slane %v318_v59, %v1360_v23 }
  0xb3   : > { %366 = vmax.xlane.f32.xlu2 %v365_v60  ;;  %363 = vmax.xlane.f32.xlu1 %v362_v61  ;;  %v425_v60 = vsel %vm196_vm0, %v1397_v53, -inf }
  0xb4   : > { %v496_v4 = vsel %vm468_vm2, %v495_v62, %v494_v2  ;;  %291 = vadd.xlane.f32.xlu0 %v290_v63 }
  0xb5   : > { %v529_v5 = vsel %vm515_vm3, %v496_v4, %v493_v46  ;;  %v422_v46 = vsel %vm196_vm0, %v1368_v27, -inf }
  0xb6   : > { %v262_v56 = vpop.xlane.xlu2 %261  ;;  %v259_v6 = vpop.xlane.xlu1 %258 }
  0xb7   : > { %v321_v50 = vmul.f32 %v1358_v22, %v262_v56  ;;  %v320_v9 = vmul.f32 %v1358_v22, %v259_v6  ;;  %v214_v10 = vpop.xlane.xlu0 %213 }
  0xb8   : > { %v305_v12 = vmul.f32 %v1358_v22, %v214_v10 }
  0xb9   : > { %v498_v15 = vperm.slane %v321_v50, %v1365_v26  ;;  %v497_v16 = vperm.slane %v320_v9, %v1360_v23 }
  0xba   : > { %v474_v18 = vperm.slane %v305_v12, %v1365_v26 }
  0xbb   : > { %v499_v19 = vsel %vm468_vm2, %v498_v15, %v497_v16  ;;  %369 = vmax.xlane.f32.xlu2 %v368_v13  ;;  %414 = vmax.xlane.f32.xlu1 %v413_v14 }
  0xbc   : > { %v530_v20 = vsel %vm517_vm4, %v499_v19, %v529_v5  ;;  %v475_v1 = vsel %vm468_vm2, %v474_v18, %v473_v11  ;;  %411 = vmax.xlane.f32.xlu0 %v410_v17 }
  0xbd   : > { %v518_v54 = vsel %vm517_vm4, %v475_v1, %v516_v49 }
  0xbe   : > { %v265_v21 = vpop.xlane.xlu2 %264  ;;  %v220_v24 = vpop.xlane.xlu1 %219 }
  0xbf   : > { %v307_v25 = vmul.f32 %v1358_v22, %v220_v24  ;;  %v217_v29 = vpop.xlane.xlu0 %216  ;;  %v322_v7 = vmul.f32 %v1358_v22, %v265_v21 }
  0xc0   : > { %v306_v55 = vmul.f32 %v1358_v22, %v217_v29 }
  0xc1   : > { %v477_v33 = vperm.slane %v307_v25, %v1365_v26  ;;  %v500_v43 = vperm.slane %v322_v7, %v1360_v23 }
  0xc2   : > { %v476_v35 = vperm.slane %v306_v55, %v1360_v23 }
  0xc3   : > { %420 = vmax.xlane.f32.xlu2 %v419_v30  ;;  %417 = vmax.xlane.f32.xlu1 %v416_v31 }
  0xc4   : > { %v478_v8 = vsel %vm468_vm2, %v477_v33, %v476_v35  ;;  %372 = vmax.xlane.f32.xlu0 %v371_v34 }
  0xc5   : > { %v520_v38 = vsel %vm519_vm5, %v478_v8, %v518_v54 }
  0xc6   : > { %v337_v39 = vpop.xlane.xlu2 %336  ;;  %v334_v0 = vpop.xlane.xlu1 %333 }
  0xc7   : > { %v573_v40 = vperm.slane %v337_v39, %v1440_v36  ;;  %v571_v41 = vperm.slane %v334_v0, %v1443_v37  ;;  %v268_v42 = vpop.xlane.xlu0 %267 }
  0xc8   : > { %v323_v44 = vmul.f32 %v1358_v22, %v268_v42 }
  0xc9   : > { %v575_v47 = vsel %vm574_vm6, %v573_v40, %v571_v41 }
  0xca   : > { %v501_v49 = vperm.slane %v323_v44, %v1365_v26 }
  0xcb   : > { %378 = vmax.xlane.f32.xlu1 %v377_v45  ;;  %423 = vmax.xlane.f32.xlu2 %v422_v46 }
  0xcc   : > { %v502_v51 = vsel %vm468_vm2, %v501_v49, %v500_v43  ;;  %375 = vmax.xlane.f32.xlu0 %v374_v48 }
  0xcd   : > { %v531_v52 = vsel %vm519_vm5, %v502_v51, %v530_v20 }
  0xce   : > { %v382_v57 = vpop.xlane.xlu2 %381  ;;  %v343_v58 = vpop.xlane.xlu1 %342 }
  0xcf   : > { %v577_v28 = vperm.slane %v343_v58, %v1440_v36  ;;  %v340_v59 = vpop.xlane.xlu0 %339  ;;  %v597_v62 = vperm.slane %v382_v57, %v1443_v37 }
  0xd0   : > { %v576_v27 = vperm.slane %v340_v59, %v1443_v37 }
  0xd2   : > { %v578_v32 = vsel %vm574_vm6, %v577_v28, %v576_v27 }
  0xd3   : > { %v621_v61 = vsel %vm515_vm3, %v578_v32, %v575_v47 }
  0xd4   : > { %426 = vmax.xlane.f32.xlu0 %v425_v60 }
  0xd6   : > { %v391_v63 = vpop.xlane.xlu2 %390  ;;  %v388_v2 = vpop.xlane.xlu1 %387 }
  0xd7   : > { %v601_v3 = vperm.slane %v391_v63, %v1440_v36  ;;  %v600_v4 = vperm.slane %v388_v2, %v1443_v37  ;;  %v385_v5 = vpop.xlane.xlu0 %384 }
  0xd8   : > { %v598_v56 = vperm.slane %v385_v5, %v1440_v36 }
  0xd9   : > { %v602_v6 = vsel %vm574_vm6, %v601_v3, %v600_v4 }
  0xda   : > { %v599_v53 = vsel %vm574_vm6, %v598_v56, %v597_v62 }
  0xdb   : > { %v628_v50 = vsel %vm515_vm3, %v602_v6, %v599_v53 }
  0xde   : > { %v271_v9 = vpop.xlane.xlu2 %270  ;;  %v226_v10 = vpop.xlane.xlu1 %225 }
  0xdf   : > { %v309_v11 = vmul.f32 %v1358_v22, %v226_v10  ;;  %v223_v12 = vpop.xlane.xlu0 %222  ;;  %v324_v16 = vmul.f32 %v1358_v22, %v271_v9  ;;  %v1129_v9 = vmov 0.0  }
  0xe0   : > { %v308_v13 = vmul.f32 %v1358_v22, %v223_v12  ;;  %429 = vst.msk [vmem:[#allocation2] sm:$0x7] %vm428_vm9, %v1129_v9 }
  0xe1   : > { %v480_v14 = vperm.slane %v309_v11, %v1365_v26  ;;  %v503_v24 = vperm.slane %v324_v16, %v1360_v23  ;;  %430 = vst.msk [vmem:[#allocation2 + $0x13] sm:$0x7] %vm428_vm9, %v1129_v9 }
  0xe2   : > { %v479_v15 = vperm.slane %v308_v13, %v1360_v23 }
  0xe4   : > { %v481_v17 = vsel %vm468_vm2, %v480_v14, %v479_v15 }
  0xe5   : > { %v522_v18 = vsel %vm521_vm7, %v481_v17, %v520_v38 }
  0xe6   : > { %v349_v19 = vpop.xlane.xlu2 %348  ;;  %v346_v20 = vpop.xlane.xlu1 %345 }
  0xe7   : > { %v580_v1 = vperm.slane %v349_v19, %v1440_v36  ;;  %v579_v54 = vperm.slane %v346_v20, %v1443_v37  ;;  %v274_v21 = vpop.xlane.xlu0 %273 }
  0xe8   : > { %v325_v25 = vmul.f32 %v1358_v22, %v274_v21 }
  0xe9   : > { %v581_v29 = vsel %vm574_vm6, %v580_v1, %v579_v54 }
  0xea   : > { %v1488_v55 = vsel %vm517_vm4, %v581_v29, %v621_v61  ;;  %v504_v30 = vperm.slane %v325_v25, %v1365_v26 }
  0xec   : > { %v505_v31 = vsel %vm468_vm2, %v504_v30, %v503_v24 }
  0xed   : > { %v532_v33 = vsel %vm521_vm7, %v505_v31, %v531_v52 }
  0xee   : > { %v229_v34 = vpop.xlane.xlu2 %228  ;;  %v397_v35 = vpop.xlane.xlu1 %396 }
  0xef   : > { %v604_v7 = vperm.slane %v397_v35, %v1440_v36  ;;  %v394_v8 = vpop.xlane.xlu0 %393  ;;  %v310_v40 = vmul.f32 %v1358_v22, %v229_v34 }
  0xf0   : > { %v603_v38 = vperm.slane %v394_v8, %v1443_v37 }
  0xf1   : > { %v482_v46 = vperm.slane %v310_v40, %v1360_v23 }
  0xf2   : > { %v605_v39 = vsel %vm574_vm6, %v604_v7, %v603_v38 }
  0xf3   : > { %v1497_v0 = vsel %vm517_vm4, %v605_v39, %v628_v50 }
  0xf6   : > { %v280_v41 = vpop.xlane.xlu2 %279  ;;  %v277_v42 = vpop.xlane.xlu1 %276 }
  0xf7   : > { %v327_v43 = vmul.f32 %v1358_v22, %v280_v41  ;;  %v326_v44 = vmul.f32 %v1358_v22, %v277_v42  ;;  %v232_v45 = vpop.xlane.xlu0 %231 }
  0xf8   : > { %v311_v47 = vmul.f32 %v1358_v22, %v232_v45 }
  0xf9   : > { %v507_v48 = vperm.slane %v327_v43, %v1365_v26  ;;  %v506_v49 = vperm.slane %v326_v44, %v1360_v23 }
  0xfa   : > { %v483_v51 = vperm.slane %v311_v47, %v1365_v26 }
  0xfb   : > { %v508_v52 = vsel %vm468_vm2, %v507_v48, %v506_v49 }
  0xfc   : > { %v1509_v57 = vsel %vm523_vm8, %v508_v52, %v532_v33  ;;  %v484_v58 = vsel %vm468_vm2, %v483_v51, %v482_v46 }
  0xfd   : > { %v524_v28 = vsel %vm523_vm8, %v484_v58, %v522_v18 }
  0xfe   : > { %v1513_v59 = vpop.xlane.xlu2 %399  ;;  %v355_v27 = vpop.xlane.xlu1 %354 }
  0xff   : > { %v352_v60 = vpop.xlane.xlu0 %351  ;;  %v583_v18 = vperm.slane %v355_v27, %v1440_v36  ;;  %v606_v44 = vperm.slane %v1513_v59, %v1443_v37 }
 0x100   : > { %v582_v19 = vperm.slane %v352_v60, %v1443_v37 }
 0x102   : > { %v584_v31 = vsel %vm574_vm6, %v583_v18, %v582_v19 }
 0x103   : > { %v623_v45 = vsel %vm519_vm5, %v584_v31, %v1488_v55  ;;  %v720_v31 = vld [vmem:[%s1738_s1 + $0x60] sm:$0xff] }
 0x106   : > { %v238_v32 = vpop.xlane.xlu2 %237  ;;  %v235_v61 = vpop.xlane.xlu1 %234 }
 0x107   : > { %v1515_v62 = vpop.xlane.xlu0 %402  ;;  %v313_v16 = vmul.f32 %v1358_v22, %v238_v32  ;;  %v312_v17 = vmul.f32 %v1358_v22, %v235_v61 }
 0x108   : > { %v607_v47 = vperm.slane %v1515_v62, %v1440_v36 }
 0x109   : > { %v486_v1 = vperm.slane %v313_v16, %v1365_v26  ;;  %v485_v54 = vperm.slane %v312_v17, %v1360_v23 }
 0x10b   : > { %v487_v7 = vsel %vm468_vm2, %v486_v1, %v485_v54 }
 0x10c   : > { %v526_v46 = vsel %vm525_vm10, %v487_v7, %v524_v28 }
 0x10e   : > { %v358_v63 = vpop.xlane.xlu2 %357  ;;  %v286_v2 = vpop.xlane.xlu1 %285 }
 0x10f   : > { %v283_v3 = vpop.xlane.xlu0 %282  ;;  %v585_v24 = vperm.slane %v358_v63, %v1443_v37  ;;  %v329_v33 = vmul.f32 %v1358_v22, %v286_v2 }
 0x110   : > { %v328_v8 = vmul.f32 %v1358_v22, %v283_v3 }
 0x111   : > { %v510_v48 = vperm.slane %v329_v33, %v1365_v26 }
 0x112   : > { %v509_v52 = vperm.slane %v328_v8, %v1360_v23 }
 0x114   : > { %v511_v18 = vsel %vm468_vm2, %v510_v48, %v509_v52  ;;  %v716_v48 = vld [vmem:[%s1738_s1 + $0x40] sm:$0xff]  ;;  %v734_v52 = vld [vmem:[%s1738_s1 + $0xd0] sm:$0xff] }
 0x116   : > { %v1517_v4 = vpop.xlane.xlu2 %408  ;;  %v1519_v5 = vpop.xlane.xlu1 %405 }
 0x117   : > { %v361_v56 = vpop.xlane.xlu0 %360  ;;  %v610_v62 = vperm.slane %v1517_v4, %v1440_v36  ;;  %v609_v63 = vperm.slane %v1519_v5, %v1443_v37 }
 0x118   : > { %v586_v25 = vperm.slane %v361_v56, %v1440_v36 }
 0x11a   : > { %v587_v41 = vsel %vm574_vm6, %v586_v25, %v585_v24  ;;  %v534_v24 = vsel %vm525_vm10, %v511_v18, %v1509_v57  ;;  %v719_v57 = vld [vmem:[%s1738_s1 + $0x58] sm:$0xff] }
 0x11b   : > { %v624_v58 = vsel %vm521_vm7, %v587_v41, %v623_v45 }
 0x11e   : > { %v289_v6 = vpop.xlane.xlu2 %288  ;;  %v244_v53 = vpop.xlane.xlu1 %243 }
 0x11f   : > { %v241_v50 = vpop.xlane.xlu0 %240  ;;  %v315_v29 = vmul.f32 %v1358_v22, %v244_v53  ;;  %v330_v60 = vmul.f32 %v1358_v22, %v289_v6 }
 0x120   : > { %v314_v30 = vmul.f32 %v1358_v22, %v241_v50 }
 0x121   : > { %v489_v42 = vperm.slane %v315_v29, %v1365_v26 }
 0x122   : > { %v488_v43 = vperm.slane %v314_v30, %v1360_v23 }
 0x124   : > { %v490_v28 = vsel %vm468_vm2, %v489_v42, %v488_v43 }
 0x125   : > { %v528_v53 = vsel %vm527_vm11, %v490_v28, %v526_v46  ;;  %v731_v28 = vld [vmem:[%s1738_s1 + $0xb8] sm:$0xff] }
 0x126   : > { %v364_v10 = vpop.xlane.xlu1 %363  ;;  %v367_v11 = vpop.xlane.xlu2 %366 }
 0x127   : > { %v292_v12 = vpop.xlane.xlu0 %291  ;;  %v589_v34 = vperm.slane %v367_v11, %v1440_v36  ;;  %v588_v35 = vperm.slane %v364_v10, %v1443_v37  ;;  %v608_v10 = vsel %vm574_vm6, %v607_v47, %v606_v44  ;;  %v512_v11 = vperm.slane %v330_v60, %v1360_v23  ;;  %v712_v60 = vld [vmem:[%s1738_s1 + $0x20] sm:$0xff] }
 0x128   : > { %v331_v32 = vmul.f32 %v1358_v22, %v292_v12  ;;  %v630_v17 = vsel %vm519_vm5, %v608_v10, %v1497_v0 }
 0x129   : > { %v590_v49 = vsel %vm574_vm6, %v589_v34, %v588_v35  ;;  %v718_v34 = vld [vmem:[%s1738_s1 + $0x50] sm:$0xff]  ;;  %v717_v35 = vld [vmem:[%s1738_s1 + $0x48] sm:$0xff] }
 0x12a   : > { %v625_v2 = vsel %vm523_vm8, %v590_v49, %v624_v58  ;;  %v513_v12 = vperm.slane %v331_v32, %v1365_v26  ;;  %v723_v26 = vld [vmem:[%s1738_s1 + $0x78] sm:$0xff]  ;;  %v714_v58 = vld [vmem:[%s1738_s1 + $0x30] sm:$0xff] }
 0x12b   : > { %742 = vmatpush.msra.mxu0 %v723_v26  ;;  %937 = vmatpush.msra.mxu2 %v723_v26  ;;  %v735_v49 = vld [vmem:[%s1738_s1 + $0xd8] sm:$0xff] }
 0x12c   : > { %769 = vmatpush.msra.mxu1 %v735_v49  ;;  %v711_v32 = vld [vmem:[%s1738_s1 + $0x18] sm:$0xff] }
 0x12e   : > { %v1521_v13 = vpop.xlane.xlu1 %414  ;;  %v370_v15 = vpop.xlane.xlu2 %369  ;;  %770 = vmatpush.msra.mxu1 %v734_v52 }
 0x12f   : > { %v1523_v14 = vpop.xlane.xlu0 %411  ;;  %v591_v38 = vperm.slane %v370_v15, %v1443_v37  ;;  %v613_v3 = vperm.slane %v1521_v13, %v1440_v36 }
 0x130   : > { %v612_v56 = vperm.slane %v1523_v14, %v1443_v37  ;;  %v611_v14 = vsel %vm574_vm6, %v610_v62, %v609_v63  ;;  %v710_v62 = vld [vmem:[%s1738_s1 + $0x10] sm:$0xff]  ;;  %v729_v63 = vld [vmem:[%s1738_s1 + $0xa8] sm:$0xff] }
 0x131   : > { %v631_v1 = vsel %vm521_vm7, %v611_v14, %v630_v17 }
 0x132   : > { %v614_v15 = vsel %vm574_vm6, %v613_v3, %v612_v56  ;;  %v728_v3 = vld [vmem:[%s1738_s1 + $0xa0] sm:$0xff] }
 0x133   : > { %v632_v0 = vsel %vm523_vm8, %v614_v15, %v631_v1  ;;  %v708_v56 = vld [vmem:[%s1738_s1] sm:$0xff] }
 0x136   : > { %v1529_v20 = vpop.xlane.xlu1 %417  ;;  %v421_v39 = vpop.xlane.xlu2 %420 }
 0x137   : > { %v373_v21 = vpop.xlane.xlu0 %372  ;;  %v616_v4 = vperm.slane %v421_v39, %v1440_v36  ;;  %v615_v5 = vperm.slane %v1529_v20, %v1443_v37  ;;  %v722_v20 = vld [vmem:[%s1738_s1 + $0x70] sm:$0xff] }
 0x138   : > { %v592_v40 = vperm.slane %v373_v21, %v1440_v36  ;;  %v721_v21 = vld [vmem:[%s1738_s1 + $0x68] sm:$0xff]  ;;  %743 = vmatpush.msra.mxu0 %v722_v20  ;;  %938 = vmatpush.msra.mxu2 %v722_v20 }
 0x139   : > { %v617_v19 = vsel %vm574_vm6, %v616_v4, %v615_v5  ;;  %v724_v4 = vld [vmem:[%s1738_s1 + $0x80] sm:$0xff] }
 0x13a   : > { %v593_v59 = vsel %vm574_vm6, %v592_v40, %v591_v38  ;;  %v633_v25 = vsel %vm525_vm10, %v617_v19, %v632_v0  ;;  %744 = vmatpush.msra.mxu0 %v721_v21  ;;  %939 = vmatpush.msra.mxu2 %v721_v21 }
 0x13b   : > { %v626_v6 = vsel %vm525_vm10, %v593_v59, %v625_v2  ;;  %v733_v59 = vld [vmem:[%s1738_s1 + $0xc8] sm:$0xff] }
 0x13c   : > { %745 = vmatpush.msra.mxu0 %v720_v31  ;;  %940 = vmatpush.msra.mxu2 %v720_v31  ;;  %v709_v2 = vld [vmem:[%s1738_s1 + $0x8] sm:$0xff] }
 0x13d   : > { %771 = vmatpush.msra.mxu1 %v733_v59 }
 0x13e   : > { %v379_v51 = vpop.xlane.xlu1 %378  ;;  %v424_v9 = vpop.xlane.xlu2 %423  ;;  %746 = vmatpush.msra.mxu0 %v719_v57  ;;  %941 = vmatpush.msra.mxu2 %v719_v57 }
 0x13f   : > { %v595_v27 = vperm.slane %v379_v51, %v1440_v36  ;;  %v376_v55 = vpop.xlane.xlu0 %375  ;;  %v618_v16 = vperm.slane %v424_v9, %v1443_v37  ;;  %v715_v51 = vld [vmem:[%s1738_s1 + $0x38] sm:$0xff] }
 0x140   : > { %v594_v61 = vperm.slane %v376_v55, %v1443_v37  ;;  %v514_v37 = vsel %vm468_vm2, %v513_v12, %v512_v11  ;;  %747 = vmatpush.msra.mxu0 %v718_v34  ;;  %942 = vmatpush.msra.mxu2 %v718_v34  ;;  %v732_v55 = vld [vmem:[%s1738_s1 + $0xc0] sm:$0xff] }
 0x141   : > { %v535_v30 = vsel %vm527_vm11, %v514_v37, %v534_v24  ;;  %772 = vmatpush.msra.mxu1 %v732_v55 }
 0x142   : > { %v596_v22 = vsel %vm574_vm6, %v595_v27, %v594_v61  ;;  %748 = vmatpush.msra.mxu0 %v717_v35  ;;  %943 = vmatpush.msra.mxu2 %v717_v35  ;;  %v713_v27 = vld [vmem:[%s1738_s1 + $0x28] sm:$0xff]  ;;  %v730_v61 = vld [vmem:[%s1738_s1 + $0xb0] sm:$0xff] }
 0x143   : > { %v627_v50 = vsel %vm527_vm11, %v596_v22, %v626_v6  ;;  %773 = vmatpush.msra.mxu1 %v731_v28  ;;  %v727_v6 = vld [vmem:[%s1738_s1 + $0x98] sm:$0xff]  ;;  %v726_v22 = vld [vmem:[%s1738_s1 + $0x90] sm:$0xff] }
 0x144   : > { %v638_v13 = vsel %vm637_vm12, %v528_v53, %v627_v50  ;;  %749 = vmatpush.msra.mxu0 %v716_v48  ;;  %944 = vmatpush.msra.mxu2 %v716_v48  ;;  %v725_v53 = vld [vmem:[%s1738_s1 + $0x88] sm:$0xff] }
 0x145   : > { %640 = vst.msk [vmem:[#allocation2 + $0x3] sm:$0xff] %vm196_vm0, %v638_v13  ;;  %774 = vmatpush.msra.mxu1 %v730_v61 }
 0x146   : > { %750 = vmatpush.msra.mxu0 %v715_v51  ;;  %945 = vmatpush.msra.mxu2 %v715_v51 }
 0x147   : > { %v427_v23 = vpop.xlane.xlu0 %426  ;;  %775 = vmatpush.msra.mxu1 %v729_v63 }
 0x148   : > { %v619_v54 = vperm.slane %v427_v23, %v1440_v36  ;;  %751 = vmatpush.msra.mxu0 %v714_v58  ;;  %946 = vmatpush.msra.mxu2 %v714_v58 }
 0x149   : > { %776 = vmatpush.msra.mxu1 %v728_v3 }
 0x14a   : > { %v620_v29 = vsel %vm574_vm6, %v619_v54, %v618_v16  ;;  %752 = vmatpush.msra.mxu0 %v713_v27  ;;  %947 = vmatpush.msra.mxu2 %v713_v27 }
 0x14b   : > { %v634_v36 = vsel %vm527_vm11, %v620_v29, %v633_v25  ;;  %777 = vmatpush.msra.mxu1 %v727_v6 }
 0x14c   : > { %v639_v33 = vsel %vm637_vm12, %v535_v30, %v634_v36  ;;  %v644_v7 = vld [vmem:[#allocation2 + $0x1] sm:$0xff]  ;;  %753 = vmatpush.msra.mxu0 %v712_v60  ;;  %948 = vmatpush.msra.mxu2 %v712_v60 }
 0x14d   : > { %641 = vst.msk [vmem:[#allocation2 + $0xb] sm:$0xff] %vm196_vm0, %v639_v33  ;;  %v646_v44 = vld [vmem:[#allocation2 + $0x2] sm:$0xff]  ;;  %778 = vmatpush.msra.mxu1 %v726_v22 }
 0x14e   : > { %v648_v47 = vld [vmem:[#allocation2 + $0x3] sm:$0xff]  ;;  %754 = vmatpush.msra.mxu0 %v711_v32  ;;  %949 = vmatpush.msra.mxu2 %v711_v32 }
 0x14f   : > { %779 = vmatpush.msra.mxu1 %v725_v53  ;;  %v642_v11 = vld [vmem:[#allocation2] sm:$0xff] }
 0x150   : > { %755 = vmatpush.msra.mxu0 %v710_v62  ;;  %950 = vmatpush.msra.mxu2 %v710_v62 }
 0x151   : > { %780 = vmatpush.msra.mxu1 %v724_v4 }
 0x152   : > { %756 = vmatpush.msra.mxu0 %v709_v2  ;;  %951 = vmatpush.msra.mxu2 %v709_v2 }
 0x154   : > { %v654_v8 = vld [vmem:[#allocation2 + $0x6] sm:$0xff]  ;;  %v655_v46 = vld [vmem:[#allocation2 + $0xe] sm:$0xff]  ;;  %757 = vmatpush.msra.mxu0 %v708_v56  ;;  %952 = vmatpush.msra.mxu2 %v708_v56 }
 0x155   : > { %v652_v38 = vld [vmem:[#allocation2 + $0x5] sm:$0xff]  ;;  %690 = vrot.lane.b32.xlu0 %v654_v8, %s1130_s24  ;;  %v653_v42 = vld [vmem:[#allocation2 + $0xd] sm:$0xff] }
 0x156   : > { %v645_v39 = vld [vmem:[#allocation2 + $0x9] sm:$0xff]  ;;  %682 = vrot.lane.b32.xlu1 %v652_v38, %s1131_s26 }
 0x157   : > { %v1008_v40 = vpack.i.bf16 %v644_v7, %v645_v39  ;;  %v647_v41 = vld [vmem:[#allocation2 + $0xa] sm:$0xff] }
 0x158   : > { %v649_v43 = vld [vmem:[#allocation2 + $0xb] sm:$0xff]  ;;  %v1013_v45 = vpack.i.bf16 %v646_v44, %v647_v41 }
 0x159   : > { %1009 = vrot.lane.b32.xlu2 %v1008_v40, %s1131_s26  ;;  %v650_v18 = vld [vmem:[#allocation2 + $0x4] sm:$0xff]  ;;  %v651_v25 = vld [vmem:[#allocation2 + $0xc] sm:$0xff] }
 0x15a   : > { %v643_v1 = vld [vmem:[#allocation2 + $0x8] sm:$0xff] }
 0x15d   : > { %684 = vrot.lane.b32.xlu0 %v653_v42, %s1131_s26 }
 0x15e   : > { %676 = vrot.lane.b32.xlu1 %v649_v43, %s1132_s27 }
 0x161   : > { %1014 = vrot.lane.b32.xlu2 %v1013_v45, %s1130_s24 }
 0x166   : > { %692 = vrot.lane.b32.xlu1 %v655_v46, %s1130_s24  ;;  %s1074_s24 = scalar_lea.hbm %s1073_s23, 16 }
 0x167   : > { %p1075_p6 = scmp.ne.s32.totalorder %s1073_s23, %s1074_s24  ;;  %p1080_p1 = scmp.lt.s32.totalorder %s1078_s28, %s1074_s24 }
 0x169   : > { %674 = vrot.lane.b32.xlu2 %v648_v47, %s1132_s27  ;;  %p1076_p9 = pnand %p1075_p6, %p1200_p11  ;;  %p1081_p3 = por %p1080_p1, %p1079_p0 }
 0x16b   : > { %p1077_p13 = pneg %p1076_p9 }
 0x16d   : > { %p1082_p4 = pnand %p1081_p3, %p1077_p13 }
 0x1b3   : > { %v1010_v5 = vpop.permute.xlu2 %1009 }
 0x1b4   : > { %v1012_v9 = vunpack.i.h.bf16 %v1010_v5  ;;  %v1011_v26 = vunpack.i.l.bf16 %v1010_v5 }
 0x1b6   : > { %v696_v12 = vsel %vm196_vm0, %v642_v11, %v1012_v9  ;;  %v697_v37 = vsel %vm196_vm0, %v643_v1, %v1011_v26 }
 0x1bb   : > { %v1015_v50 = vpop.permute.xlu2 %1014 }
 0x1bc   : > { %v1017_v10 = vunpack.i.h.bf16 %v1015_v50  ;;  %v1016_v20 = vunpack.i.l.bf16 %v1015_v50 }
 0x1be   : > { %v699_v14 = vsel %vm698_vm13, %v696_v12, %v1017_v10  ;;  %v700_v0 = vsel %vm698_vm13, %v697_v37, %v1016_v20 }
 0x1c3   : > { %v675_v13 = vpop.permute.xlu2 %674 }
 0x1c4   : > { %v702_v15 = vsel %vm701_vm14, %v699_v14, %v675_v13 }
 0x1c5   : > { %758 = vmatmul.f32.vlgmr.msra.gmra.mxu0 %v702_v15 }
 0x1c7   : > { %v691_v16 = vpop.permute.xlu0 %690 }
 0x1c8   : > { %v683_v17 = vpop.permute.xlu1 %682 }
 0x1c9   : > { %v704_v19 = vsel %vm196_vm0, %v650_v18, %v683_v17 }
 0x1ca   : > { %v706_v23 = vsel %vm698_vm13, %v704_v19, %v691_v16 }
 0x1cb   : > { %926 = vmatmul.msk.f32.vlgmr.msra.gmra.mxu1 %vm701_vm14, %v706_v23 }
 0x1cf   : > { %v685_v24 = vpop.permute.xlu0 %684 }
 0x1d0   : > { %v677_v54 = vpop.permute.xlu1 %676  ;;  %v705_v29 = vsel %vm196_vm0, %v651_v25, %v685_v24 }
 0x1d1   : > { %v703_v21 = vsel %vm701_vm14, %v700_v0, %v677_v54 }
 0x1d2   : > { %761 = vmatmul.f32.vlgmr.msra.gmra.mxu2 %v703_v21 }
 0x1d8   : > { %v693_v30 = vpop.permute.xlu1 %692 }
 0x1d9   : > { %v707_v36 = vsel %vm698_vm13, %v705_v29, %v693_v30 }
 0x1da   : > { %927 = vmatmul.msk.f32.gmra.mxu1 %vm701_vm14, %v707_v36 }
 0x242   : > { %v759_v31 = vpop.f32.mrf.mxu0 }
 0x248   : > { %v782_v33 = vpop.f32.mrf.mxu1 }
 0x249   : > { %v783_v57 = vadd.f32 %v782_v33, %v759_v31 }
 0x24b   : > { %v928_v34 = vmul.f32 -1.442695, %v783_v57 }
 0x24d   : > { %1020 = vpow2.f32 %v928_v34 }
 0x253   : > { %v1021_v35 = vpop.eup %1020 }
 0x254   : > { %v794_v7 = vadd.f32 1.0, %v1021_v35 }
 0x255   : > { %v762_v8 = vpop.f32.mrf.mxu2 }
 0x256   : > { %1022 = vrcp.f32 %v794_v7  ;;  %v807_v44 = vand.u32 2147483648, %v794_v7  ;;  %v805_v46 = vand.u32 2147483647, %v794_v7  ;;  %vm801_vm0 = vweird.f32 %v794_v7 }
 0x257   : > { %v785_v38 = vpop.f32.mrf.mxu1 }
 0x258   : > { %v786_v39 = vadd.f32 %v785_v38, %v762_v8  ;;  %v808_v51 = vor.u32 1.1754944e-38, %v807_v44  ;;  %vm806_vm2 = vcmp.eq.f32.partialorder %v805_v46, 8.507059e+37 }
 0x25a   : > { %v929_v40 = vmul.f32 -1.442695, %v786_v39 }
 0x25c   : > { %v1023_v41 = vpop.eup %1022  ;;  %1024 = vpow2.f32 %v929_v40 }
 0x25d   : > { %v797_v42 = vmul.f32 %v1023_v41, %v794_v7  ;;  %vm802_vm15 = vweird.f32 %v1023_v41 }
 0x25e   : > { %vm803_vm1 = vmor %vm801_vm0, %vm802_vm15 }
 0x25f   : > { %v798_v43 = vsub.f32 1.0, %v797_v42 }
 0x261   : > { %v799_v45 = vmul.f32 %v1023_v41, %v798_v43 }
 0x262   : > { %v1025_v47 = vpop.eup %1024 }
 0x263   : > { %v800_v48 = vadd.f32 %v1023_v41, %v799_v45  ;;  %v795_v49 = vadd.f32 1.0, %v1025_v47 }
 0x265   : > { %v804_v52 = vsel %vm803_vm1, %v1023_v41, %v800_v48  ;;  %1026 = vrcp.f32 %v795_v49  ;;  %v822_v60 = vand.u32 2147483648, %v795_v49  ;;  %v820_v32 = vand.u32 2147483647, %v795_v49 }
 0x266   : > { %v809_v58 = vsel %vm806_vm2, %v808_v51, %v804_v52  ;;  %vm816_vm4 = vweird.f32 %v795_v49 }
 0x267   : > { %826 = vst.msk [vmem:[%s163_s6] sm:$0xff] %vm637_vm12, %v809_v58  ;;  %v823_v62 = vor.u32 1.1754944e-38, %v822_v60  ;;  %vm821_vm6 = vcmp.eq.f32.partialorder %v820_v32, 8.507059e+37 }
 0x26b   : > { %v1027_v59 = vpop.eup %1026 }
 0x26c   : > { %v812_v27 = vmul.f32 %v1027_v59, %v795_v49  ;;  %vm817_vm3 = vweird.f32 %v1027_v59 }
 0x26d   : > { %vm818_vm5 = vmor %vm816_vm4, %vm817_vm3 }
 0x26e   : > { %v813_v55 = vsub.f32 1.0, %v812_v27 }
 0x270   : > { %v814_v28 = vmul.f32 %v1027_v59, %v813_v55 }
 0x272   : > { %v815_v61 = vadd.f32 %v1027_v59, %v814_v28 }
 0x274   : > { %v819_v63 = vsel %vm818_vm5, %v1027_v59, %v815_v61 }
 0x275   : > { %v824_v2 = vsel %vm821_vm6, %v823_v62, %v819_v63 }
 0x276   : > { %827 = vst.msk [vmem:[%s163_s6 + $0x8] sm:$0xff] %vm637_vm12, %v824_v2 }
 0x277   : > { %1085 = shalt.err (!%p1082_p4)
}
 0x278   : > { %s1133_s25 = smov 128   ;;  %s1134_s30 = smov 8  }
 0x279   : > { %955 = dma.vmem_to_hbm [thread:$0]  (%p1200_p11), %s842_s17, 256, %s844_s19, %s829_s13, %s1133_s25, %s1133_s25, %s1134_s30  }
 0x27a PF: > { %s858_s3 = sand.u32 1, %s1112_s9   ;;  %p1745_p7 = scmp.ge.s32.totalorder %s1124_s12, 2 }
 0x27b   : > { %s859_s4 = scalar_lea.sflag [#allocation5], %s858_s3 }
 0x27c   : > { %p962_p5 = pnand %p1745_p7, %p1204_p12 }
 0x27e   : > { %p963_p8 = pneg %p962_p5 }
 0x280   : > { %1107 = dma.done.wait (%p963_p8), %s859_s4, 256  }
 0x281   : > { %1109 = vsyncadd (%p963_p8), %s859_s4, 4294967040  ;;  %p15_p10 = scmp.ge.s32.totalorder %s1175_s15, 4   ;;  %s1746_s9 = smov %s1116_s10 }
 0x282   : > { %s1747_s10 = smov %s1120_s11  ;;  %s1748_s11 = smov %s1187_s18 }
 0x283   : > { %s1749_s12 = smov %s1175_s15  ;;  %17 = sbr.rel (!%p15_p10) target bundleno = 5 (0x5), region = 73 }
 0x288   :  { %865 = vsyncpa [#allocation4], 1 }
 0x289   :  { %867 = vsyncpa [#allocation4 + $0x1], 1 }
 0x28a   :  { %868 = vsyncpa [#allocation5], 1 }
 0x28b   :  { %870 = vsyncpa [#allocation5 + $0x1], 1 }

</bundles_post_ra>
